<compile_context>
chip_gen: v7x
topology: tpu7x:2x2x1
jax: 0.10.0
libtpu: 0.0.40
codegen_flags: <defaults>
</compile_context>

<pallas_src>
import jax
import jax.numpy as jnp
from jax.experimental import pallas as pl
from jax.experimental.pallas import tpu as pltpu


# ---- Config (small, synthetic; matches the PyTorch module) -----------------
class Config:
    batch_size = 2
    features = 8
    d_model = 128


def _embedding_kernel(x_ref, w_ref, b_ref, o_ref):
    # x_ref: (R, 1) full column, resident across grid steps (constant index_map)
    # w_ref / b_ref / o_ref: (TR, D) lane-dense blocks for this grid step
    tr = w_ref.shape[0]
    # Row offset of this block inside the resident x column.  TR is either a
    # multiple of 8 or the grid has a single step (offset 0), so the hint holds.
    r0 = pl.multiple_of(pl.program_id(0) * tr, 8)
    x_col = x_ref[pl.ds(r0, tr), :].astype(jnp.float32)          # (TR, 1)
    w = w_ref[...].astype(jnp.float32)                           # (TR, D)
    b = b_ref[...].astype(jnp.float32)                           # (TR, D)
    # Single fused multiply-add, broadcast along lanes; unmasked lane-dense store.
    o_ref[...] = (x_col * w + b).astype(o_ref.dtype)


def embedding_forward(x, weights, bias, *, target_block_rows=1024):
    """x: (B, F) -> out: (B, F, D) == x[..., None] * weights + bias."""
    B, F, D = weights.shape
    R = B * F

    # Flatten to lane-dense (R, D) slabs; x becomes a tiny (R, 1) column.
    x_col = x.reshape(R, 1).astype(weights.dtype)
    w2 = weights.reshape(R, D)
    b2 = bias.reshape(R, D)

    # Row-block size: full extent for small problems (single grid step), else
    # `target_block_rows` (multiple of 8) when it divides R evenly.  Falling
    # back to full extent keeps the (8, 128) block rule satisfied for any R.
    if R > target_block_rows and R % target_block_rows == 0:
        TR = target_block_rows
    else:
        TR = R
    grid = (R // TR,)

    # VMEM budget: double-buffered w/b/out blocks + resident x + headroom.
    itemsize = jnp.dtype(weights.dtype).itemsize
    block_bytes = TR * D * itemsize
    vmem_bytes = 2 * 3 * block_bytes + R * itemsize + (2 << 20)
    vmem_bytes = int(min(max(vmem_bytes, 8 << 20), 32 << 20))  # safe on v5e..v7x

    out2 = pl.pallas_call(
        _embedding_kernel,
        out_shape=jax.ShapeDtypeStruct((R, D), weights.dtype),
        grid_spec=pl.GridSpec(
            grid=grid,
            in_specs=[
                # Whole x column, constant index map -> one DMA, stays resident.
                pl.BlockSpec((R, 1), lambda i: (0, 0)),
                pl.BlockSpec((TR, D), lambda i: (i, 0)),
                pl.BlockSpec((TR, D), lambda i: (i, 0)),
            ],
            out_specs=pl.BlockSpec((TR, D), lambda i: (i, 0)),
        ),
        compiler_params=pltpu.CompilerParams(
            dimension_semantics=("parallel",),
            vmem_limit_bytes=vmem_bytes,
        ),
    )(x_col, w2, b2)

    return out2.reshape(B, F, D)


if __name__ == "__main__":
    B, F, D = Config.batch_size, Config.features, Config.d_model

    key = jax.random.PRNGKey(0)
    kx, kw, kb = jax.random.split(key, 3)

    # Deterministic "randn"-style parameter init (as in the module's __init__).
    weights = jax.random.normal(kw, (B, F, D), dtype=jnp.float32)
    bias = jax.random.normal(kb, (B, F, D), dtype=jnp.float32)
    # Input: anything that views to (B, F, 1); use (B, F).
    x = jax.random.normal(kx, (B, F), dtype=jnp.float32)

    out = embedding_forward(x, weights, bias)
    out = jax.block_until_ready(out)

    # Reference check (plain JAX, mirrors PyTorch broadcasting semantics).
    ref = x.reshape(B, F, 1) * weights + bias
    assert out.shape == (B, F, D)
    assert jnp.allclose(out, ref, atol=1e-6, rtol=1e-6)

    print("KERNEL_OK")
</pallas_src>

<mosaic_0001>
module attributes {stable_mosaic.version = 11 : i64} {
  func.func @_embedding_kernel(%arg0: i32, %arg1: memref<16x1xf32, #tpu.memory_space<vmem>>, %arg2: memref<16x128xf32, #tpu.memory_space<vmem>>, %arg3: memref<16x128xf32, #tpu.memory_space<vmem>>, %arg4: memref<16x128xf32, #tpu.memory_space<vmem>>) attributes {dimension_semantics = [#tpu.dimension_semantics<parallel>], iteration_bounds = array<i64: 1>, scalar_prefetch = 0 : i64, scratch_operands = 0 : i64, tpu.core_type = #tpu.core_type<tc>, window_params = [{pipeline_mode = #tpu.pipeline_mode<synchronous>, transform_indices = @transform_0, window_bounds = array<i64: 16, 1>}, {transform_indices = @transform_1, window_bounds = array<i64: 16, 128>}, {transform_indices = @transform_2, window_bounds = array<i64: 16, 128>}, {transform_indices = @transform_3, window_bounds = array<i64: 16, 128>}]} {
    %c16_i32 = arith.constant 16 : i32
    %0 = arith.muli %arg0, %c16_i32 : i32
    %1 = tpu.assume_multiple %0, 8 : i32
    %2 = arith.index_cast %1 : i32 to index
    %c0 = arith.constant 0 : index
    %3 = vector.load %arg1[%2, %c0] : memref<16x1xf32, #tpu.memory_space<vmem>>, vector<16x1xf32>
    %c0_0 = arith.constant 0 : index
    %c0_1 = arith.constant 0 : index
    %4 = vector.load %arg2[%c0_0, %c0_1] : memref<16x128xf32, #tpu.memory_space<vmem>>, vector<16x128xf32>
    %c0_2 = arith.constant 0 : index
    %c0_3 = arith.constant 0 : index
    %5 = vector.load %arg3[%c0_2, %c0_3] : memref<16x128xf32, #tpu.memory_space<vmem>>, vector<16x128xf32>
    %6 = vector.broadcast %3 : vector<16x1xf32> to vector<16x128xf32>
    %7 = arith.mulf %6, %4 : vector<16x128xf32>
    %8 = arith.addf %7, %5 : vector<16x128xf32>
    %c0_4 = arith.constant 0 : index
    %c0_5 = arith.constant 0 : index
    %9 = vector.load %arg4[%c0_4, %c0_5] : memref<16x128xf32, #tpu.memory_space<vmem>>, vector<16x128xf32>
    tpu.vector_store %arg4[%c0_4, %c0_5], %8 {strides = array<i32>} : memref<16x128xf32, #tpu.memory_space<vmem>>, vector<16x128xf32>,
    return
  }
  func.func @transform_0(%arg0: i32) -> (i32, i32) {
    %c0_i32 = arith.constant 0 : i32
    %c0_i32_0 = arith.constant 0 : i32
    %c0_i32_1 = arith.constant 0 : i32
    return %c0_i32, %c0_i32_0 : i32, i32
  }
  func.func @transform_1(%arg0: i32) -> (i32, i32) {
    %c0_i32 = arith.constant 0 : i32
    %c0_i32_0 = arith.constant 0 : i32
    return %arg0, %c0_i32 : i32, i32
  }
  func.func @transform_2(%arg0: i32) -> (i32, i32) {
    %c0_i32 = arith.constant 0 : i32
    %c0_i32_0 = arith.constant 0 : i32
    return %arg0, %c0_i32 : i32, i32
  }
  func.func @transform_3(%arg0: i32) -> (i32, i32) {
    %c0_i32 = arith.constant 0 : i32
    %c0_i32_0 = arith.constant 0 : i32
    return %arg0, %c0_i32 : i32, i32
  }
}

</mosaic_0001>

<bundles_post_ra>
// kernel: tpu_custom_call.1
= control target key start
LH: loop header
LB: loop body
LE: loop exit
PB: predicated region body
PF: predicated region fallthrough
CT: control target
= control target key end

     0   :  { %8 = vsyncpa [#allocation3], 0  ;;  %s191_s0 = inlined_call_operand.vmem [shape: f32[16,1], index: 0, kind: input, shape index: {}]   ;;  %s192_s1 = inlined_call_operand.vmem [shape: f32[16,128], index: 1, kind: input, shape index: {}]   ;;  %s193_s2 = inlined_call_operand.hbm [shape: f32[16,128], index: 2, kind: input, shape index: {}]   ;;  %s194_s3 = inlined_call_operand.hbm [shape: f32[16,128], index: 3, kind: output, shape index: {}]  }
   0x1   :  { %9 = vsyncpa [#allocation4], 0  ;;  %s124_s12 = smov [#allocation2]   ;;  %s76_s16 = scalar_lea.hbm %s193_s2, 256 }
   0x2   :  { %s19_s13 = sshll.u32 %s124_s12, 4  ;;  %p77_p0 = scmp.ne.s32.totalorder %s193_s2, %s76_s16  ;;  %s20_s13 = int_to_ptr.vmem [resolvable:$true] %s19_s13 }
   0x3   :  { %p80_p1 = scmp.lt.u32.totalorder %s76_s16, %s193_s2 }
   0x5   :  { %p82_p2 = pnand %p80_p1, %p77_p0 }
   0x7   :  { %85 = shalt.err (!%p82_p2)
}
   0x8   :  { %s86_s21 = scalar_lea.vmem %s20_s13, 256  ;;  %p91_p4 = scmp.lt.s32.totalorder %s20_s13, %s20_s13 }
   0x9   :  { %p87_p3 = scmp.ne.s32.totalorder %s20_s13, %s86_s21  ;;  %p92_p5 = scmp.lt.s32.totalorder %s86_s21, %s86_s21 }
   0xb   :  { %p93_p6 = por %p92_p5, %p91_p4 }
   0xd   :  { %p94_p7 = pnand %p93_p6, %p87_p3 }
   0xf   :  { %97 = shalt.err (!%p94_p7)
}
  0x10   :  { %s125_s22 = smov 128   ;;  %s126_s23 = smov 8  }
  0x11   :  { %25 = dma.hbm_to_vmem [thread:$0]  %s193_s2, 256, %s20_s13, [#allocation3], %s125_s22, %s125_s22, %s126_s23  }
  0x12   :  { %120 = dma.done.wait [#allocation3], 256  }
  0x13   :  { %121 = vsyncadd [#allocation3], 4294967040  ;;  %v127_v0 = vmov 0   ;;  %v31_v1 = vld [vmem:[%s191_s0] sm:$0xff]  ;;  %v32_v2 = vld [vmem:[%s191_s0 + $0x8] sm:$0xff]  ;;  %s128_s6 = smov [#allocation5]  }
  0x14   :  { %75 = vset.pattern.permute.xlu0 %v127_v0  ;;  %v33_v3 = vld [vmem:[%s192_s1] sm:$0xff]  ;;  %v34_v7 = vld [vmem:[%s192_s1 + $0x8] sm:$0xff]  ;;  %s58_s7 = sshll.u32 %s128_s6, 4  ;;  %s59_s7 = int_to_ptr.vmem [resolvable:$true] %s58_s7 }
  0x15   :  { %39 = vperm.xlu0 %75, %v31_v1   ;;  %v35_v4 = vld [vmem:[#allocation2] sm:$0xff]  ;;  %v36_v9 = vld [vmem:[#allocation2 + $0x8] sm:$0xff]  ;;  %s98_s0 = scalar_lea.vmem %s59_s7, 256  ;;  %p103_p9 = scmp.lt.s32.totalorder %s59_s7, %s59_s7 }
  0x16   :  { %p99_p8 = scmp.ne.s32.totalorder %s59_s7, %s98_s0  ;;  %p104_p10 = scmp.lt.s32.totalorder %s98_s0, %s98_s0 }
  0x18   :  { %p105_p11 = por %p104_p10, %p103_p9 }
  0x19   :  { %44 = vperm.xlu0 %75, %v32_v2  }
  0x1a   :  { %p106_p12 = pnand %p105_p11, %p99_p8 }
  0x94   :  { %v40_v5 = vpop.permute.xlu0 %39 }
  0x95   :  { %v47_v6 = vmul.f32 %v40_v5, %v33_v3 }
  0x97   :  { %v49_v8 = vadd.f32 %v47_v6, %v35_v4 }
  0x98   :  { %v45_v10 = vpop.permute.xlu0 %44 }
  0x99   :  { %51 = vst [vmem:[#allocation5] sm:$0xff] %v49_v8  ;;  %v48_v11 = vmul.f32 %v45_v10, %v34_v7 }
  0x9b   :  { %v50_v12 = vadd.f32 %v48_v11, %v36_v9 }
  0x9d   :  { %52 = vst [vmem:[#allocation5 + $0x8] sm:$0xff] %v50_v12 }
  0x9e   :  { %109 = shalt.err (!%p106_p12)
}
  0x9f   :  { %s110_s1 = scalar_lea.hbm %s194_s3, 256 }
  0xa0   :  { %p111_p13 = scmp.ne.s32.totalorder %s194_s3, %s110_s1  ;;  %p114_p0 = scmp.lt.u32.totalorder %s110_s1, %s194_s3 }
  0xa2   :  { %p116_p1 = pnand %p114_p0, %p111_p13 }
  0xa4   :  { %119 = shalt.err (!%p116_p1)
}
  0xa5   :  { %64 = dma.vmem_to_hbm [thread:$0]  %s59_s7, 256, %s194_s3, [#allocation4], %s125_s22, %s125_s22, %s126_s23  }
  0xa6   :  { %122 = dma.done.wait [#allocation4], 256  }
  0xa7   :  { %123 = vsyncadd [#allocation4], 4294967040 }
  0xa8   :  { %68 = vsyncpa [#allocation3], 1 }
  0xa9   :  { %69 = vsyncpa [#allocation4], 1 }

</bundles_post_ra>
